<compile_context>
chip_gen: v6e
topology: v6e:2x2x1
jax: 0.10.0
libtpu: 0.0.40
codegen_flags: <defaults>
</compile_context>

<pallas_src>
import functools

import jax
import jax.numpy as jnp
from jax.experimental import pallas as pl
from jax.experimental.pallas import tpu as pltpu


def _round_up(x, m):
    return ((x + m - 1) // m) * m


def _mlp_kernel(*refs, n_extra_hidden):
    if n_extra_hidden > 0:
        x_ref, w1_ref, b1_ref, wh_ref, bh_ref, wf_ref, bf_ref, o_ref = refs
    else:
        x_ref, w1_ref, b1_ref, wf_ref, bf_ref, o_ref = refs
        wh_ref = bh_ref = None

    # fc1 + ReLU : bf16 matmul operands (x cast in-kernel), f32 accumulation.
    x = x_ref[...].astype(jnp.bfloat16)
    h = jnp.dot(x, w1_ref[...], preferred_element_type=jnp.float32)
    h = jnp.maximum(h + b1_ref[...], 0.0)

    # extra hidden layers + ReLU (static Python loop; n_extra_hidden is compile-time)
    for i in range(n_extra_hidden):
        h = jnp.dot(h.astype(jnp.bfloat16), wh_ref[i],
                    preferred_element_type=jnp.float32)
        h = jnp.maximum(h + bh_ref[i], 0.0)

    # final linear (no activation); lane-padded output stored in bf16 (unmasked vst).
    out = jnp.dot(h.astype(jnp.bfloat16), wf_ref[...],
                  preferred_element_type=jnp.float32)
    o_ref[...] = (out + bf_ref[...]).astype(o_ref.dtype)


def init_linear_dqn_params(key, n_features, n_actions,
                           n_hidden_layers=2, n_units_per_layer=64,
                           dtype=jnp.float32):
    """Deterministic init mimicking PyTorch nn.Linear default (uniform +/- 1/sqrt(fan_in))."""
    if n_hidden_layers < 1:
        raise ValueError("There must be at least one hidden layer.")
    H = n_units_per_layer
    n_extra = n_hidden_layers - 1
    keys = jax.random.split(key, 6)

    def u(k, shape, fan_in):
        bound = 1.0 / jnp.sqrt(jnp.asarray(fan_in, jnp.float32))
        return jax.random.uniform(k, shape, dtype, -bound, bound)

    params = {
        # stored already transposed: (in, out)
        "w1": u(keys[0], (n_features, H), n_features),
        "b1": u(keys[1], (1, H), n_features),
        "wf": u(keys[4], (H, n_actions), H),
        "bf": u(keys[5], (1, n_actions), H),
    }
    if n_extra > 0:
        params["wh"] = u(keys[2], (n_extra, H, H), H)
        params["bh"] = u(keys[3], (n_extra, 1, H), H)
    return params


def prepare_params(params, n_actions):
    """One-time preprocessing: bf16 matmul operands, f32 biases, lane-pad final layer.

    Call once (e.g. after each optimizer step for a DQN), not per forward.
    """
    n_pad = max(128, _round_up(n_actions, 128))
    prepped = {
        "w1": params["w1"].astype(jnp.bfloat16),
        "b1": params["b1"].astype(jnp.float32),
        "wf": jnp.pad(params["wf"],
                      ((0, 0), (0, n_pad - n_actions))).astype(jnp.bfloat16),
        "bf": jnp.pad(params["bf"],
                      ((0, 0), (0, n_pad - n_actions))).astype(jnp.float32),
    }
    if "wh" in params:
        prepped["wh"] = params["wh"].astype(jnp.bfloat16)
        prepped["bh"] = params["bh"].astype(jnp.float32)
    return prepped


def linear_dqn_forward(x, prepared, *, n_features, n_actions,
                       n_hidden_layers=2, n_units_per_layer=64,
                       batch_tile=2048):
    """Pallas forward pass of LinearDQN using prepare_params() output.

    x can be any shape; it is flattened to (-1, n_features) like x.view(-1, n_features).
    """
    H = n_units_per_layer
    n_extra = n_hidden_layers - 1
    x2 = x.reshape(-1, n_features)
    B = x2.shape[0]
    out_dtype = x2.dtype
    N_pad = prepared["wf"].shape[1]

    # ---- batch tiling ----
    # Small batches: single block. Moderate/large batches: at least 2 tiles so the
    # parallel batch axis can shard across v7x's two TensorCores; cap at batch_tile.
    if B < 256:
        bt = max(16, _round_up(B, 16))
    else:
        bt = min(_round_up(batch_tile, 16), _round_up(pl.cdiv(B, 2), 16))
    num_tiles = pl.cdiv(B, bt)
    B_pad = num_tiles * bt   # output rows; partial *input* block overhang is undefined
    #                          but only feeds rows that are sliced off below.

    kernel = functools.partial(_mlp_kernel, n_extra_hidden=n_extra)

    in_specs = [
        # x: tiled over batch (only per-step DMA); f32, cast to bf16 inside kernel.
        pl.BlockSpec((bt, n_features), lambda i: (i, 0)),
        # weights / biases: constant block index -> fetched once, resident.
        pl.BlockSpec((n_features, H), lambda i: (0, 0)),
        pl.BlockSpec((1, H), lambda i: (0, 0)),
    ]
    args = [x2, prepared["w1"], prepared["b1"]]
    if n_extra > 0:
        in_specs += [
            pl.BlockSpec((n_extra, H, H), lambda i: (0, 0, 0)),
            pl.BlockSpec((n_extra, 1, H), lambda i: (0, 0, 0)),
        ]
        args += [prepared["wh"], prepared["bh"]]
    in_specs += [
        pl.BlockSpec((H, N_pad), lambda i: (0, 0)),
        pl.BlockSpec((1, N_pad), lambda i: (0, 0)),
    ]
    args += [prepared["wf"], prepared["bf"]]

    out = pl.pallas_call(
        kernel,
        # bf16 output halves the dominant HBM writeback stream; still lane-dense.
        out_shape=jax.ShapeDtypeStruct((B_pad, N_pad), jnp.bfloat16),
        grid_spec=pltpu.PrefetchScalarGridSpec(
            num_scalar_prefetch=0,
            grid=(num_tiles,),
            in_specs=in_specs,
            out_specs=pl.BlockSpec((bt, N_pad), lambda i: (i, 0)),
        ),
        compiler_params=pltpu.CompilerParams(
            dimension_semantics=("parallel",)),
    )(*args)

    # strip batch padding and lane padding, restore caller dtype
    return out[:B, :n_actions].astype(out_dtype)


def _reference_forward(x, params, *, n_features, n_hidden_layers, use_bf16=False):
    def mm(a, b):
        if use_bf16:
            a = a.astype(jnp.bfloat16)
            b = b.astype(jnp.bfloat16)
        return jnp.dot(a, b, preferred_element_type=jnp.float32)

    x2 = x.reshape(-1, n_features)
    h = jnp.maximum(mm(x2, params["w1"]) + params["b1"], 0.0)
    for i in range(n_hidden_layers - 1):
        h = jnp.maximum(mm(h, params["wh"][i]) + params["bh"][i], 0.0)
    return mm(h, params["wf"]) + params["bf"]


if __name__ == "__main__":
    # Module hyperparameters (small, consistent with the forward)
    n_features = 16
    n_actions = 4
    n_hidden_layers = 2
    n_units_per_layer = 64

    key = jax.random.PRNGKey(0)
    kx, kp = jax.random.split(key)

    # Input of shape (2, 4, 16): forward flattens to (-1, 16) -> batch of 8 rows.
    x = jax.random.normal(kx, (2, 4, 16), dtype=jnp.float32)

    params = init_linear_dqn_params(
        kp, n_features, n_actions,
        n_hidden_layers=n_hidden_layers,
        n_units_per_layer=n_units_per_layer)
    prepared = prepare_params(params, n_actions)   # one-time preprocessing

    out = linear_dqn_forward(
        x, prepared,
        n_features=n_features, n_actions=n_actions,
        n_hidden_layers=n_hidden_layers,
        n_units_per_layer=n_units_per_layer,
        batch_tile=2048)
    out = jax.block_until_ready(out)

    # Check vs a JAX reference using the same bf16 matmul operands
    # (kernel additionally stores the result in bf16, hence the tolerance).
    ref_bf16 = _reference_forward(x, params, n_features=n_features,
                                  n_hidden_layers=n_hidden_layers, use_bf16=True)
    # Loose sanity check vs the full-f32 reference.
    ref_f32 = _reference_forward(x, params, n_features=n_features,
                                 n_hidden_layers=n_hidden_layers, use_bf16=False)

    assert out.shape == (8, n_actions)
    assert jnp.allclose(out, ref_bf16, atol=1e-2, rtol=1e-2), "mismatch vs bf16 reference"
    assert jnp.allclose(out, ref_f32, atol=1e-1, rtol=1e-1), "mismatch vs f32 reference"

    print("KERNEL_OK")
</pallas_src>

<mosaic_0001>
module attributes {stable_mosaic.version = 11 : i64} {
  func.func @_mlp_kernel(%arg0: i32, %arg1: memref<16x16xf32, #tpu.memory_space<vmem>>, %arg2: memref<16x64xbf16, #tpu.memory_space<vmem>>, %arg3: memref<1x64xf32, #tpu.memory_space<vmem>>, %arg4: memref<1x64x64xbf16, #tpu.memory_space<vmem>>, %arg5: memref<1x1x64xf32, #tpu.memory_space<vmem>>, %arg6: memref<64x128xbf16, #tpu.memory_space<vmem>>, %arg7: memref<1x128xf32, #tpu.memory_space<vmem>>, %arg8: memref<16x128xbf16, #tpu.memory_space<vmem>>) attributes {dimension_semantics = [#tpu.dimension_semantics<parallel>], iteration_bounds = array<i64: 1>, scalar_prefetch = 0 : i64, scratch_operands = 0 : i64, tpu.core_type = #tpu.core_type<tc>, window_params = [{transform_indices = @transform_0, window_bounds = array<i64: 16, 16>}, {pipeline_mode = #tpu.pipeline_mode<synchronous>, transform_indices = @transform_1, window_bounds = array<i64: 16, 64>}, {pipeline_mode = #tpu.pipeline_mode<synchronous>, transform_indices = @transform_2, window_bounds = array<i64: 1, 64>}, {pipeline_mode = #tpu.pipeline_mode<synchronous>, transform_indices = @transform_3, window_bounds = array<i64: 1, 64, 64>}, {pipeline_mode = #tpu.pipeline_mode<synchronous>, transform_indices = @transform_4, window_bounds = array<i64: 1, 1, 64>}, {pipeline_mode = #tpu.pipeline_mode<synchronous>, transform_indices = @transform_5, window_bounds = array<i64: 64, 128>}, {pipeline_mode = #tpu.pipeline_mode<synchronous>, transform_indices = @transform_6, window_bounds = array<i64: 1, 128>}, {transform_indices = @transform_7, window_bounds = array<i64: 16, 128>}]} {
    %c0 = arith.constant 0 : index
    %c0_0 = arith.constant 0 : index
    %0 = vector.load %arg1[%c0, %c0_0] : memref<16x16xf32, #tpu.memory_space<vmem>>, vector<16x16xf32>
    %1 = arith.truncf %0 : vector<16x16xf32> to vector<16x16xbf16>
    %c0_1 = arith.constant 0 : index
    %c0_2 = arith.constant 0 : index
    %2 = vector.load %arg2[%c0_1, %c0_2] : memref<16x64xbf16, #tpu.memory_space<vmem>>, vector<16x64xbf16>
    %cst = arith.constant dense<0.000000e+00> : vector<16x64xf32>
    %3 = tpu.matmul %1, %2, %cst {dimension_numbers = #tpu.dot_dimension_numbers<[1], [0], [0], [1], [0, 0, 1, 1], [], []>} : vector<16x16xbf16>, vector<16x64xbf16>, vector<16x64xf32> -> vector<16x64xf32>
    %c0_3 = arith.constant 0 : index
    %c0_4 = arith.constant 0 : index
    %4 = vector.load %arg3[%c0_3, %c0_4] : memref<1x64xf32, #tpu.memory_space<vmem>>, vector<1x64xf32>
    %5 = vector.broadcast %4 : vector<1x64xf32> to vector<16x64xf32>
    %6 = arith.addf %3, %5 : vector<16x64xf32>
    %cst_5 = arith.constant 0.000000e+00 : f32
    %7 = vector.broadcast %cst_5 : f32 to vector<16x64xf32>
    %8 = arith.maximumf %6, %7 : vector<16x64xf32>
    %9 = arith.truncf %8 : vector<16x64xf32> to vector<16x64xbf16>
    %c0_6 = arith.constant 0 : index
    %c0_7 = arith.constant 0 : index
    %c0_8 = arith.constant 0 : index
    %10 = vector.load %arg4[%c0_6, %c0_7, %c0_8] : memref<1x64x64xbf16, #tpu.memory_space<vmem>>, vector<1x64x64xbf16>
    %11 = vector.shape_cast %10 : vector<1x64x64xbf16> to vector<64x64xbf16>
    %cst_9 = arith.constant dense<0.000000e+00> : vector<16x64xf32>
    %12 = tpu.matmul %9, %11, %cst_9 {dimension_numbers = #tpu.dot_dimension_numbers<[1], [0], [0], [1], [0, 0, 1, 1], [], []>} : vector<16x64xbf16>, vector<64x64xbf16>, vector<16x64xf32> -> vector<16x64xf32>
    %c0_10 = arith.constant 0 : index
    %c0_11 = arith.constant 0 : index
    %c0_12 = arith.constant 0 : index
    %13 = vector.load %arg5[%c0_10, %c0_11, %c0_12] : memref<1x1x64xf32, #tpu.memory_space<vmem>>, vector<1x1x64xf32>
    %14 = vector.shape_cast %13 : vector<1x1x64xf32> to vector<1x64xf32>
    %15 = vector.broadcast %14 : vector<1x64xf32> to vector<16x64xf32>
    %16 = arith.addf %12, %15 : vector<16x64xf32>
    %cst_13 = arith.constant 0.000000e+00 : f32
    %17 = vector.broadcast %cst_13 : f32 to vector<16x64xf32>
    %18 = arith.maximumf %16, %17 : vector<16x64xf32>
    %19 = arith.truncf %18 : vector<16x64xf32> to vector<16x64xbf16>
    %c0_14 = arith.constant 0 : index
    %c0_15 = arith.constant 0 : index
    %20 = vector.load %arg6[%c0_14, %c0_15] : memref<64x128xbf16, #tpu.memory_space<vmem>>, vector<64x128xbf16>
    %cst_16 = arith.constant dense<0.000000e+00> : vector<16x128xf32>
    %21 = tpu.matmul %19, %20, %cst_16 {dimension_numbers = #tpu.dot_dimension_numbers<[1], [0], [0], [1], [0, 0, 1, 1], [], []>} : vector<16x64xbf16>, vector<64x128xbf16>, vector<16x128xf32> -> vector<16x128xf32>
    %c0_17 = arith.constant 0 : index
    %c0_18 = arith.constant 0 : index
    %22 = vector.load %arg7[%c0_17, %c0_18] : memref<1x128xf32, #tpu.memory_space<vmem>>, vector<1x128xf32>
    %23 = vector.broadcast %22 : vector<1x128xf32> to vector<16x128xf32>
    %24 = arith.addf %21, %23 : vector<16x128xf32>
    %25 = arith.truncf %24 : vector<16x128xf32> to vector<16x128xbf16>
    %c0_19 = arith.constant 0 : index
    %c0_20 = arith.constant 0 : index
    %26 = vector.load %arg8[%c0_19, %c0_20] : memref<16x128xbf16, #tpu.memory_space<vmem>>, vector<16x128xbf16>
    tpu.vector_store %arg8[%c0_19, %c0_20], %25 {strides = array<i32>} : memref<16x128xbf16, #tpu.memory_space<vmem>>, vector<16x128xbf16>,
    return
  }
  func.func @transform_0(%arg0: i32) -> (i32, i32) {
    %c0_i32 = arith.constant 0 : i32
    %c0_i32_0 = arith.constant 0 : i32
    return %arg0, %c0_i32 : i32, i32
  }
  func.func @transform_1(%arg0: i32) -> (i32, i32) {
    %c0_i32 = arith.constant 0 : i32
    %c0_i32_0 = arith.constant 0 : i32
    %c0_i32_1 = arith.constant 0 : i32
    return %c0_i32, %c0_i32_0 : i32, i32
  }
  func.func @transform_2(%arg0: i32) -> (i32, i32) {
    %c0_i32 = arith.constant 0 : i32
    %c0_i32_0 = arith.constant 0 : i32
    %c0_i32_1 = arith.constant 0 : i32
    return %c0_i32, %c0_i32_0 : i32, i32
  }
  func.func @transform_3(%arg0: i32) -> (i32, i32, i32) {
    %c0_i32 = arith.constant 0 : i32
    %c0_i32_0 = arith.constant 0 : i32
    %c0_i32_1 = arith.constant 0 : i32
    %c0_i32_2 = arith.constant 0 : i32
    return %c0_i32, %c0_i32_0, %c0_i32_1 : i32, i32, i32
  }
  func.func @transform_4(%arg0: i32) -> (i32, i32, i32) {
    %c0_i32 = arith.constant 0 : i32
    %c0_i32_0 = arith.constant 0 : i32
    %c0_i32_1 = arith.constant 0 : i32
    %c0_i32_2 = arith.constant 0 : i32
    return %c0_i32, %c0_i32_0, %c0_i32_1 : i32, i32, i32
  }
  func.func @transform_5(%arg0: i32) -> (i32, i32) {
    %c0_i32 = arith.constant 0 : i32
    %c0_i32_0 = arith.constant 0 : i32
    %c0_i32_1 = arith.constant 0 : i32
    return %c0_i32, %c0_i32_0 : i32, i32
  }
  func.func @transform_6(%arg0: i32) -> (i32, i32) {
    %c0_i32 = arith.constant 0 : i32
    %c0_i32_0 = arith.constant 0 : i32
    %c0_i32_1 = arith.constant 0 : i32
    return %c0_i32, %c0_i32_0 : i32, i32
  }
  func.func @transform_7(%arg0: i32) -> (i32, i32) {
    %c0_i32 = arith.constant 0 : i32
    %c0_i32_0 = arith.constant 0 : i32
    return %arg0, %c0_i32 : i32, i32
  }
}

</mosaic_0001>

<bundles_post_ra>
// kernel: tpu_custom_call.1
= control target key start
LH: loop header
LB: loop body
LE: loop exit
PB: predicated region body
PF: predicated region fallthrough
CT: control target
= control target key end

     0   :  { %12 = vsyncpa [#allocation3], 0  ;;  %s631_s0 = inlined_call_operand.hbm [shape: f32[8,16], index: 0, kind: input, shape index: {}]   ;;  %s632_s1 = inlined_call_operand.hbm [shape: bf16[16,64], index: 1, kind: input, shape index: {}]   ;;  %s633_s2 = inlined_call_operand.vmem [shape: f32[1,64], index: 2, kind: input, shape index: {}]   ;;  %s634_s3 = inlined_call_operand.hbm [shape: bf16[1,64,64], index: 3, kind: input, shape index: {}]   ;;  %s635_s4 = inlined_call_operand.vmem [shape: f32[1,1,64], index: 4, kind: input, shape index: {}]   ;;  %s636_s5 = inlined_call_operand.hbm [shape: bf16[64,128], index: 5, kind: input, shape index: {}]   ;;  %s637_s6 = inlined_call_operand.vmem [shape: f32[1,128], index: 6, kind: input, shape index: {}]   ;;  %s638_s7 = inlined_call_operand.hbm [shape: bf16[16,128], index: 7, kind: output, shape index: {}]  }
   0x1   :  { %13 = vsyncpa [#allocation6], 0 }
   0x2   :  { %14 = vsyncpa [#allocation9], 0 }
   0x3   :  { %15 = vsyncpa [#allocation4], 0 }
   0x4   :  { %20 = vsyncadd [#allocation3], 128  ;;  %s542_s24 = smov [#allocation5]  }
   0x5   :  { %s33_s25 = sshll.u32 %s542_s24, 4  ;;  %s34_s25 = int_to_ptr.vmem [resolvable:$true] %s33_s25 }
   0x6   :  { %s442_s26 = scalar_lea.vmem %s34_s25, 128  ;;  %p447_p1 = scmp.lt.s32.totalorder %s34_s25, %s34_s25 }
   0x7   :  { %p443_p0 = scmp.ne.s32.totalorder %s34_s25, %s442_s26  ;;  %p448_p2 = scmp.lt.s32.totalorder %s442_s26, %s442_s26 }
   0x9   :  { %p449_p3 = por %p448_p2, %p447_p1 }
   0xb   :  { %p450_p4 = pnand %p449_p3, %p443_p0 }
   0xd   :  { %453 = shalt.err (!%p450_p4)
}
   0xe   :  { %s543_s27 = smov 64   ;;  %s544_s28 = smov 4  }
   0xf   :  { %39 = dma.hbm_to_vmem [thread:$0]  %s632_s1, 128, %s34_s25, [#allocation6], %s543_s27, %s543_s27, %s544_s28  }
  0x10   :  { %s545_s8 = smov [#allocation2]  }
  0x11   :  { %s21_s9 = sshll.u32 %s545_s8, 4  ;;  %s22_s9 = int_to_ptr.vmem [resolvable:$true] %s21_s9 }
  0x12   :  { %s462_s10 = scalar_lea.vmem %s22_s9, 128  ;;  %s466_s11 = scalar_lea.vmem %s22_s9, 256 }
  0x13   :  { %p463_p5 = scmp.ne.s32.totalorder %s22_s9, %s462_s10  ;;  %p467_p6 = scmp.lt.s32.totalorder %s22_s9, %s22_s9 }
  0x14   :  { %p468_p7 = scmp.lt.s32.totalorder %s466_s11, %s462_s10 }
  0x16   :  { %p469_p8 = por %p468_p7, %p467_p6 }
  0x18   :  { %p470_p9 = pnand %p469_p8, %p463_p5 }
  0x1a   :  { %473 = shalt.err (!%p470_p9)
}
  0x1b   :  { %s546_s12 = smov 128   ;;  %s547_s13 = smov 8  }
  0x1c   :  { %27 = dma.hbm_to_vmem [thread:$0]  %s631_s0, 128, %s22_s9, [#allocation3], %s546_s12, %s546_s12, %s547_s13  }
  0x1d   :  { %s548_s16 = smov [#allocation7]   ;;  %s549_s1 = smov [#allocation8]  }
  0x1e   :  { %s47_s17 = sshll.u32 %s548_s16, 4  ;;  %s61_s18 = sshll.u32 %s549_s1, 4  ;;  %s48_s17 = int_to_ptr.vmem [resolvable:$true] %s47_s17  ;;  %s62_s18 = int_to_ptr.vmem [resolvable:$true] %s61_s18 }
  0x1f   :  { %s482_s19 = scalar_lea.vmem %s48_s17, 512  ;;  %p487_p11 = scmp.lt.s32.totalorder %s48_s17, %s48_s17 }
  0x20   :  { %p483_p10 = scmp.ne.s32.totalorder %s48_s17, %s482_s19  ;;  %p488_p12 = scmp.lt.s32.totalorder %s482_s19, %s482_s19 }
  0x22   :  { %p489_p13 = por %p488_p12, %p487_p11 }
  0x24   :  { %p490_p0 = pnand %p489_p13, %p483_p10 }
  0x26   :  { %493 = shalt.err (!%p490_p0)
}
  0x27   :  { %53 = dma.hbm_to_vmem [thread:$0]  %s634_s3, 512, %s48_s17, [#allocation6], %s543_s27, %s543_s27, %s544_s28  }
  0x28   :  { %s502_s0 = scalar_lea.vmem %s62_s18, 512  ;;  %p507_p2 = scmp.lt.s32.totalorder %s62_s18, %s62_s18 }
  0x29   :  { %p503_p1 = scmp.ne.s32.totalorder %s62_s18, %s502_s0  ;;  %p508_p3 = scmp.lt.s32.totalorder %s502_s0, %s502_s0 }
  0x2b   :  { %p509_p4 = por %p508_p3, %p507_p2 }
  0x2d   :  { %p510_p5 = pnand %p509_p4, %p503_p1 }
  0x2f   :  { %513 = shalt.err (!%p510_p5)
}
  0x30   :  { %67 = dma.hbm_to_vmem [thread:$0]  %s636_s5, 512, %s62_s18, [#allocation9], %s543_s27, %s543_s27, %s544_s28  }
  0x31   :  { %534 = dma.done.wait [#allocation3], 256  }
  0x32   :  { %535 = vsyncadd [#allocation3], 4294967040 }
  0x33   :  { %536 = dma.done.wait [#allocation6], 640  }
  0x34   :  { %537 = vsyncadd [#allocation6], 4294966656 }
  0x35   :  { %538 = dma.done.wait [#allocation9], 512  }
  0x36   :  { %539 = vsyncadd [#allocation9], 4294966784  ;;  %v550_v0 = vmov 0.0   ;;  %vm551_vm0 = vmmov 0   ;;  %v425_v1 = vld [vmem:[#allocation5] sm:$0xff]   ;;  %v83_v2 = vld [vmem:[#allocation2] sm:$0xff] }
  0x37   :  { %384 = vmatprep.subr.bf16.mxu0 %v550_v0  ;;  %386 = vmatprep.mubr.msk.bf16.mxu0 %vm551_vm0, %v550_v0  ;;  %v84_v3 = vld [vmem:[#allocation2 + $0x8] sm:$0xff]  ;;  %vm101_vm1 = vcmask 130048   ;;  %v426_v5 = vld [vmem:[#allocation7 + $0x18] sm:$0xff]   ;;  %v428_v7 = vld [vmem:[#allocation7 + $0x8] sm:$0xff]   ;;  %vm188_vm2 = vcmask 523264   ;;  %s552_s29 = smov [#allocation10]  }
  0x38   :  { %390 = vmatprep.subr.bf16.mxu1 %v550_v0  ;;  %398 = vmatprep.mubr.msk.bf16.mxu1 %vm551_vm0, %v550_v0  ;;  %v85_v4 = vpack.c.bf16 %v84_v3, %v83_v2  ;;  %v427_v6 = vld [vmem:[#allocation7 + $0x10] sm:$0xff]   ;;  %v429_v8 = vld [vmem:[#allocation7] sm:$0xff]   ;;  %v430_v9 = vld [vmem:[#allocation8 + $0x18] sm:$0xff]  }
  0x39   :  { %385 = vmatpush3.bf16.msra.mxu0 %v425_v1  ;;  %391 = vmatpush3.bf16.msra.mxu1 %v426_v5  ;;  %v348_v10 = vld [vmem:[%s633_s2] ss:$0 sm:$0xff]  ;;  %v431_v20 = vld [vmem:[#allocation8 + $0x10] sm:$0xff]   ;;  %v433_v22 = vld [vmem:[#allocation8] sm:$0xff]  }
  0x3a   :  { %402 = vmatprep.subr.bf16.mxu0 %v550_v0  ;;  %392 = vmatprep.subr.bf16.mxu1 %v550_v0  ;;  %v432_v21 = vld [vmem:[#allocation8 + $0x8] sm:$0xff]  }
  0x3b   :  { %v351_v23 = vld [vmem:[%s635_s4] ss:$0 sm:$0xff]  ;;  %s334_s4 = sshll.u32 %s552_s29, 4  ;;  %s335_s4 = int_to_ptr.vmem [resolvable:$true] %s334_s4 }
  0x3c   :  { %387 = vmatmul.mubr.msk.bf16.vlgmr.msra.gmra.mxu0 %vm101_vm1, %v85_v4  ;;  %v357_v34 = vld [vmem:[%s637_s6] ss:$0 sm:$0xff]  ;;  %s514_s30 = scalar_lea.vmem %s335_s4, 128  ;;  %p519_p7 = scmp.lt.s32.totalorder %s335_s4, %s335_s4 }
  0x3d   :  { %410 = vmatprep.mubr.msk.bf16.mxu0 %vm551_vm0, %v550_v0  ;;  %393 = vmatpush3.bf16.msra.mxu1 %v427_v6  ;;  %p515_p6 = scmp.ne.s32.totalorder %s335_s4, %s514_s30  ;;  %p520_p8 = scmp.lt.s32.totalorder %s514_s30, %s514_s30 }
  0x3e   :  { %394 = vmatprep.subr.bf16.mxu1 %v550_v0  ;;  %403 = vmatpush3.bf16.msra.mxu0 %v430_v9 }
  0x3f   :  { %404 = vmatprep.subr.bf16.mxu0 %v550_v0  ;;  %p521_p9 = por %p520_p8, %p519_p7 }
  0x41   :  { %395 = vmatpush3.bf16.msra.mxu1 %v428_v7  ;;  %p522_p10 = pnand %p521_p9, %p515_p6 }
  0x42   :  { %396 = vmatprep.subr.bf16.mxu1 %v550_v0  ;;  %405 = vmatpush3.bf16.msra.mxu0 %v431_v20 }
  0x43   :  { %406 = vmatprep.subr.bf16.mxu0 %v550_v0 }
  0x45   :  { %397 = vmatpush3.bf16.msra.mxu1 %v429_v8 }
  0x46   :  { %407 = vmatpush3.bf16.msra.mxu0 %v432_v21 }
  0x47   :  { %408 = vmatprep.subr.bf16.mxu0 %v550_v0 }
  0x4a   :  { %409 = vmatpush3.bf16.msra.mxu0 %v433_v22 }
  0xfc   :  { %v139_v11 = vpop.f32.mrf.mxu0 }
  0xfd   :  { %v140_v13 = vadd.f32 %v348_v10, %v139_v11 }
  0xfe   :  { %v388_v12 = vpop.f32.mrf.mxu0 }
  0xff   :  { %v146_v17 = vmax.f32 %v140_v13, 0.0 }
 0x100   :  { %v142_v14 = vpop.f32.mrf.mxu0 }
 0x101   :  { %v143_v15 = vadd.f32 %v348_v10, %v142_v14 }
 0x102   :  { %v389_v16 = vpop.f32.mrf.mxu0 }
 0x103   :  { %v147_v18 = vmax.f32 %v143_v15, 0.0 }
 0x105   :  { %v148_v19 = vpack.c.bf16 %v147_v18, %v146_v17 }
 0x107   :  { %399 = vmatmul.mubr.msk.bf16.vlgmr.msra.gmra.mxu1 %vm188_vm2, %v148_v19 }
 0x1c7   :  { %v226_v24 = vpop.f32.mrf.mxu1 }
 0x1c8   :  { %v227_v26 = vadd.f32 %v351_v23, %v226_v24 }
 0x1c9   :  { %v400_v25 = vpop.f32.mrf.mxu1 }
 0x1ca   :  { %v233_v30 = vmax.f32 %v227_v26, 0.0 }
 0x1cb   :  { %v229_v27 = vpop.f32.mrf.mxu1 }
 0x1cc   :  { %v230_v28 = vadd.f32 %v351_v23, %v229_v27 }
 0x1cd   :  { %v401_v29 = vpop.f32.mrf.mxu1 }
 0x1ce   :  { %v234_v31 = vmax.f32 %v230_v28, 0.0 }
 0x1d0   :  { %v235_v32 = vpack.c.bf16 %v234_v31, %v233_v30 }
 0x1d2   :  { %411 = vmatmul.mubr.msk.bf16.vlgmr.msra.gmra.mxu0 %vm188_vm2, %v235_v32 }
 0x292   :  { %v312_v33 = vpop.f32.mrf.mxu0 }
 0x293   :  { %v313_v37 = vadd.f32 %v357_v34, %v312_v33 }
 0x294   :  { %v412_v35 = vpop.f32.mrf.mxu0 }
 0x296   :  { %v315_v36 = vpop.f32.mrf.mxu0 }
 0x297   :  { %v316_v38 = vadd.f32 %v357_v34, %v315_v36 }
 0x298   :  { %v413_v39 = vpop.f32.mrf.mxu0 }
 0x299   :  { %v370_v40 = vpack.c.bf16 %v316_v38, %v313_v37 }
 0x29b   :  { %371 = vst [vmem:[#allocation10] sm:$0xff] %v370_v40  }
 0x29c   :  { %525 = shalt.err (!%p522_p10)
}
 0x29d   :  { %340 = dma.vmem_to_hbm [thread:$0]  %s335_s4, 128, %s638_s7, [#allocation4], %s543_s27, %s543_s27, %s544_s28  }
 0x29e   :  { %540 = dma.done.wait [#allocation4], 128  }
 0x29f   :  { %541 = vsyncadd [#allocation4], 4294967168 }
 0x2a0   :  { %344 = vsyncpa [#allocation3], 1 }
 0x2a1   :  { %345 = vsyncpa [#allocation6], 1 }
 0x2a2   :  { %346 = vsyncpa [#allocation9], 1 }
 0x2a3   :  { %347 = vsyncpa [#allocation4], 1 }

</bundles_post_ra>
